<compile_context>
chip_gen: v7x
topology: tpu7x:2x2x1
jax: 0.10.0
libtpu: 0.0.40
codegen_flags: <defaults>
</compile_context>

<pallas_src>
import jax
import jax.numpy as jnp
from jax.experimental import pallas as pl
from jax.experimental.pallas import tpu as pltpu


def sir_ode_kernel(bg_ref, si_ref, dy_ref):
    # beta/gamma live in SMEM (scalar path).
    beta = bg_ref[0]
    gamma = bg_ref[1]

    # si_ref is a (2, TILE_H, W) view holding only the S and I planes.
    S = si_ref[0]
    I = si_ref[1]

    bSI = beta * S * I          # computed once, reused for dS and dI
    gI = gamma * I

    dy_ref[0] = -bSI            # dS
    dy_ref[1] = bSI - gI        # dI
    dy_ref[2] = gI              # dR


def sir_ode(t, y, beta, gamma, *, tile_h=512):
    """Pallas equivalent of ODE.forward(t, y, beta, gamma).

    t is unused (kept for API parity with the torch module).
    y: (3, H, W) float32 with W a multiple of 128 (or small enough to be a
       single full-extent block); beta/gamma: python/jnp scalars.
    Returns dy with the same shape/dtype as y (stack of [dS, dI, dR]).
    """
    del t  # unused, exactly as in the torch module
    C, H, W = y.shape
    assert C == 3, "y must stack the three compartments [S, I, R] on axis 0"

    # beta/gamma packed into one SMEM scalar array.
    bg = jnp.stack(
        [jnp.asarray(beta, dtype=y.dtype), jnp.asarray(gamma, dtype=y.dtype)]
    )

    # Largest H-tile that is <= tile_h; full-H block if the array is small.
    # When tiling, keep the sublane dim a multiple of 8.
    if H <= tile_h:
        th = H
    else:
        th = max(8, (tile_h // 8) * 8)
    grid = (pl.cdiv(H, th),)

    return pl.pallas_call(
        sir_ode_kernel,
        out_shape=jax.ShapeDtypeStruct(y.shape, y.dtype),
        grid=grid,
        in_specs=[
            pl.BlockSpec(memory_space=pltpu.SMEM),                # [beta, gamma]
            pl.BlockSpec((2, th, W), lambda i: (0, i, 0)),        # S and I planes
        ],
        out_specs=pl.BlockSpec((3, th, W), lambda i: (0, i, 0)),  # [dS, dI, dR]
        compiler_params=pltpu.CompilerParams(
            dimension_semantics=("parallel",),
        ),
    )(bg, y)


if __name__ == "__main__":
    key = jax.random.PRNGKey(0)
    H, W = 64, 256              # small, (8,128)-aligned state grid per compartment
    TILE_H = 32                 # 2 grid steps -> exercises the pipelined path
    y = jax.random.uniform(key, (3, H, W), dtype=jnp.float32)
    t = jnp.float32(0.0)
    beta = 0.3
    gamma = 0.1

    dy = sir_ode(t, y, beta, gamma, tile_h=TILE_H)
    dy = jax.block_until_ready(dy)

    # Reference (plain JAX) for correctness check.
    S, I, _ = y[0], y[1], y[2]
    dS = -beta * S * I
    dI = beta * S * I - gamma * I
    dR = gamma * I
    ref = jnp.stack([dS, dI, dR])

    assert dy.shape == y.shape and dy.dtype == y.dtype
    assert jnp.allclose(dy, ref, atol=1e-6, rtol=1e-6)
    print("KERNEL_OK")
</pallas_src>

<mosaic_0001>
module attributes {stable_mosaic.version = 11 : i64} {
  func.func @sir_ode_kernel(%arg0: i32, %arg1: memref<2xf32, #tpu.memory_space<smem>>, %arg2: memref<2x32x256xf32, #tpu.memory_space<vmem>>, %arg3: memref<3x32x256xf32, #tpu.memory_space<vmem>>) attributes {dimension_semantics = [#tpu.dimension_semantics<parallel>], iteration_bounds = array<i64: 2>, scalar_prefetch = 0 : i64, scratch_operands = 0 : i64, tpu.core_type = #tpu.core_type<tc>, window_params = [{transform_indices = @transform_0, window_bounds = array<i64: 2>}, {transform_indices = @transform_1, window_bounds = array<i64: 2, 32, 256>}, {transform_indices = @transform_2, window_bounds = array<i64: 3, 32, 256>}]} {
    %c0 = arith.constant 0 : index
    %0 = memref.load %arg1[%c0] : memref<2xf32, #tpu.memory_space<smem>>
    %c1 = arith.constant 1 : index
    %1 = memref.load %arg1[%c1] : memref<2xf32, #tpu.memory_space<smem>>
    %c0_0 = arith.constant 0 : index
    %c0_1 = arith.constant 0 : index
    %c0_2 = arith.constant 0 : index
    %2 = vector.load %arg2[%c0_0, %c0_1, %c0_2] : memref<2x32x256xf32, #tpu.memory_space<vmem>>, vector<1x32x256xf32>
    %3 = vector.shape_cast %2 : vector<1x32x256xf32> to vector<32x256xf32>
    %c1_3 = arith.constant 1 : index
    %c0_4 = arith.constant 0 : index
    %c0_5 = arith.constant 0 : index
    %4 = vector.load %arg2[%c1_3, %c0_4, %c0_5] : memref<2x32x256xf32, #tpu.memory_space<vmem>>, vector<1x32x256xf32>
    %5 = vector.shape_cast %4 : vector<1x32x256xf32> to vector<32x256xf32>
    %6 = vector.broadcast %0 : f32 to vector<32x256xf32>
    %7 = arith.mulf %6, %3 : vector<32x256xf32>
    %8 = arith.mulf %7, %5 : vector<32x256xf32>
    %9 = vector.broadcast %1 : f32 to vector<32x256xf32>
    %10 = arith.mulf %9, %5 : vector<32x256xf32>
    %cst = arith.constant 0.000000e+00 : f32
    %11 = vector.broadcast %cst : f32 to vector<32x256xf32>
    %12 = arith.subf %11, %8 : vector<32x256xf32>
    %c0_6 = arith.constant 0 : index
    %c0_7 = arith.constant 0 : index
    %c0_8 = arith.constant 0 : index
    %13 = vector.load %arg3[%c0_6, %c0_7, %c0_8] : memref<3x32x256xf32, #tpu.memory_space<vmem>>, vector<1x32x256xf32>
    %14 = vector.shape_cast %13 : vector<1x32x256xf32> to vector<32x256xf32>
    %15 = vector.shape_cast %12 : vector<32x256xf32> to vector<1x32x256xf32>
    tpu.vector_store %arg3[%c0_6, %c0_7, %c0_8], %15 {strides = array<i32>} : memref<3x32x256xf32, #tpu.memory_space<vmem>>, vector<1x32x256xf32>,
    %16 = arith.subf %8, %10 : vector<32x256xf32>
    %c1_9 = arith.constant 1 : index
    %c0_10 = arith.constant 0 : index
    %c0_11 = arith.constant 0 : index
    %17 = vector.load %arg3[%c1_9, %c0_10, %c0_11] : memref<3x32x256xf32, #tpu.memory_space<vmem>>, vector<1x32x256xf32>
    %18 = vector.shape_cast %17 : vector<1x32x256xf32> to vector<32x256xf32>
    %19 = vector.shape_cast %16 : vector<32x256xf32> to vector<1x32x256xf32>
    tpu.vector_store %arg3[%c1_9, %c0_10, %c0_11], %19 {strides = array<i32>} : memref<3x32x256xf32, #tpu.memory_space<vmem>>, vector<1x32x256xf32>,
    %c2 = arith.constant 2 : index
    %c0_12 = arith.constant 0 : index
    %c0_13 = arith.constant 0 : index
    %20 = vector.load %arg3[%c2, %c0_12, %c0_13] : memref<3x32x256xf32, #tpu.memory_space<vmem>>, vector<1x32x256xf32>
    %21 = vector.shape_cast %20 : vector<1x32x256xf32> to vector<32x256xf32>
    %22 = vector.shape_cast %10 : vector<32x256xf32> to vector<1x32x256xf32>
    tpu.vector_store %arg3[%c2, %c0_12, %c0_13], %22 {strides = array<i32>} : memref<3x32x256xf32, #tpu.memory_space<vmem>>, vector<1x32x256xf32>,
    return
  }
  func.func @transform_0(%arg0: i32) -> i32 {
    %c0_i32 = arith.constant 0 : i32
    %c0_i32_0 = arith.constant 0 : i32
    return %c0_i32 : i32
  }
  func.func @transform_1(%arg0: i32) -> (i32, i32, i32) {
    %c0_i32 = arith.constant 0 : i32
    %c0_i32_0 = arith.constant 0 : i32
    %c0_i32_1 = arith.constant 0 : i32
    return %c0_i32, %arg0, %c0_i32_0 : i32, i32, i32
  }
  func.func @transform_2(%arg0: i32) -> (i32, i32, i32) {
    %c0_i32 = arith.constant 0 : i32
    %c0_i32_0 = arith.constant 0 : i32
    %c0_i32_1 = arith.constant 0 : i32
    return %c0_i32, %arg0, %c0_i32_0 : i32, i32, i32
  }
}

</mosaic_0001>

<bundles_post_ra>
// kernel: tpu_custom_call.1
= control target key start
LH: loop header
LB: loop body
LE: loop exit
PB: predicated region body
PF: predicated region fallthrough
CT: control target
= control target key end

     0   :  { %7 = vsyncpa [#allocation5], 0  ;;  %s819_s0 = inlined_call_operand.hbm [shape: f32[2], index: 0, kind: input, shape index: {}]   ;;  %s820_s1 = inlined_call_operand.hbm [shape: f32[3,64,256], index: 1, kind: input, shape index: {}]   ;;  %s821_s2 = inlined_call_operand.hbm [shape: f32[3,64,256], index: 2, kind: output, shape index: {}]  }
   0x1   :  { %8 = vsyncpa [#allocation3], 0 }
   0x2   :  { %10 = vsyncpa [#allocation3 + $0x1], 0 }
   0x3   :  { %11 = vsyncpa [#allocation4], 0 }
   0x4   :  { %13 = vsyncpa [#allocation4 + $0x1], 0  ;;  %s630_s9 = smov 0   ;;  %s632_s10 = smov 0  }
   0x5   :  { %s634_s11 = smov 0   ;;  %s636_s12 = smov 0  }
   0x6 LB: > { %s651_s13 = sadd.s32 4294967295, %s599_s12   ;;  %s418_s14 = sadd.s32 4294967294, %s599_s12   ;;  %s599_s12 = sphi %s636_s12, %s830_s12   ;;  %s595_s11 = sphi %s634_s11, %s829_s11   ;;  %s591_s10 = sphi %s632_s10, %s828_s10   ;;  %s587_s9 = sphi %s630_s9, %s827_s9  }
   0x7   : > { %s655_s15 = sadd.s32 1, %s599_s12   ;;  %s47_s16 = sadd.s32 1, %s595_s11 }
   0x8   : > { %s44_s17 = ssub.s32 %s599_s12, %s655_s15  ;;  %p54_p0 = scmp.ne.s32.totalorder %s595_s11, %s591_s10 }
   0x9   : > { %p45_p1 = scmp.eq.s32.totalorder %s44_s17, 0  ;;  %p55_p2 = scmp.eq.s32.totalorder %s599_s12, 0 }
   0xa   : > { %p60_p3 = scmp.ne.s32.totalorder %s591_s10, %s587_s9  ;;  %p61_p4 = scmp.eq.s32.totalorder %s651_s13, 0 }
   0xb   : > { %s667_s18 = scalar_select %p45_p1, %s595_s11, %s47_s16  }
   0xc   : > { %p669_p5 = por %p55_p2, %p54_p0  ;;  %p675_p6 = por %p61_p4, %p60_p3 }
   0xd   : > { %p84_p7 = scmp.eq.s32.totalorder %s651_s13, 1  ;;  %p90_p8 = scmp.eq.s32.totalorder %s418_s14, 1 }
   0xe   : > { %p419_p9 = scmp.ge.s32.totalorder %s599_s12, 1  ;;  %p97_p10 = scmp.lt.s32.totalorder %s599_s12, 3 }
   0xf   : > { %p682_p11 = por %p84_p7, %p54_p0  ;;  %p686_p12 = por %p90_p8, %p60_p3 }
  0x10   : > { %p690_p13 = pnand %p419_p9, %p97_p10  ;;  %s544_s26 = scalar_lea.hbm %s819_s0, 16 }
  0x11   : > { %p545_p0 = scmp.ne.s32.totalorder %s819_s0, %s544_s26  ;;  %p551_p9 = scmp.lt.u32.totalorder %s544_s26, %s819_s0 }
  0x12   : > { %p487_p1 = pneg %p690_p13 }
  0x14   : > { %p488_p2 = pnand %p487_p1, %p61_p4 }
  0x16   : > { %p546_p3 = pneg %p488_p2 }
  0x18   : > { %p547_p7 = pnand %p546_p3, %p545_p0 }
  0x1a   : > { %p548_p8 = pneg %p547_p7 }
  0x1c   : > { %p553_p10 = pnand %p551_p9, %p548_p8 }
  0x1e   : > { %556 = shalt.err (!%p553_p10)
}
  0x1f   : > { %s601_s3 = smov [#allocation2]   ;;  %p421_p1 = scmp.ge.s32.totalorder %s599_s12, 2 }
  0x20   : > { %490 = dma.hbm_to_smem (!%p488_p2), %s819_s0, 16, %s601_s3, [#allocation5]  }
  0x21   : > { %115 = sbr.rel (%p421_p1) target bundleno = 53 (0x35), region = 20 }
  0x28   : > { %s119_s6 = sand.u32 1, %s595_s11   ;;  %s462_s7 = sshll.u32 %s599_s12, 10 }
  0x29   : > { %s422_s8 = sshll.u32 %s119_s6, 7  ;;  %s130_s17 = scalar_lea.hbm %s820_s1, %s462_s7 }
  0x2a   : > { %s468_s24 = scalar_select %p669_p5, [#allocation0], [#allocation12] }
  0x2b   : > { %s123_s25 = scalar_lea.vmem [#allocation6], %s422_s8  ;;  %s602_s28 = smov 2048  }
  0x2c   : > { %s143_s26 = sshll.u32 %s123_s25, 4  ;;  %s135_s27 = sld [smem:[%s468_s24]]   ;;  %s144_s26 = int_to_ptr.vmem [resolvable:$true] %s143_s26 }
  0x2d   : > { %469 = sst [smem:[#allocation9]] (%p669_p5), %s602_s28  ;;  %s603_s29 = smov 1024  }
  0x2e   : > { %470 = sst [smem:[#allocation9 + $0x1]] (%p669_p5), %s603_s29  ;;  %s604_s30 = smov 4  }
  0x2f   : > { %471 = sst [smem:[#allocation9 + $0x2]] (%p669_p5), %s604_s30  ;;  %s605_s3 = smov 256  }
  0x30   : > { %472 = sst [smem:[#allocation9 + $0x3]] (%p669_p5), %s605_s3  ;;  %s606_s5 = smov 16  }
  0x31   : > { %473 = sst [smem:[#allocation9 + $0x4]] (%p669_p5), %s605_s3  ;;  %s120_s8 = scalar_lea.sflag [#allocation3], %s119_s6 }
  0x32   : > { %s426_s4 = sshll.u32 %s135_s27, 26  ;;  %474 = sst [smem:[#allocation9 + $0x5]] (%p669_p5), %s606_s5 }
  0x33   : > { %s427_s7 = sadd.s32 134217728, %s426_s4  ;;  %s607_s14 = smov [#allocation8]  }
  0x34   : > { %475 = dma.general (%p669_p5), %s130_s17, 2048, %s144_s26, %s120_s8, %s607_s14, [#allocation9], %s427_s7, 0  }
  0x35 PF: > { %168 = sbr.rel (%p690_p13) target bundleno = 101 (0x65), region = 28 }
  0x3c   : > { %574 = dma.done.wait (%p61_p4), [#allocation5], 16  }
  0x3d   : > { %576 = vsyncadd (%p61_p4), [#allocation5], 4294967280  ;;  %s741_s16 = sand.u32 1, %s591_s10  }
  0x3e   : > { %s430_s6 = sshll.u32 %s741_s16, 7  ;;  %s175_s24 = scalar_lea.sflag [#allocation3], %s741_s16 }
  0x3f   : > { %s178_s19 = scalar_lea.vmem [#allocation6], %s430_s6 }
  0x40   : > { %578 = dma.done.wait (%p675_p6), %s175_s24, 2048  }
  0x41   : > { %580 = vsyncadd (%p675_p6), %s175_s24, 4294965248 }
  0x42   : > { %183 = sfence }
  0x43   : > { %s202_s23 = sld [smem:[#allocation2]]  ;;  %v204_v0 = vld [vmem:[%s178_s19] sm:$0xff]  ;;  %v205_v1 = vld [vmem:[%s178_s19 + $0x8] sm:$0xff]  ;;  %v206_v4 = vld [vmem:[%s178_s19 + $0x10] sm:$0xff]  ;;  %s749_s17 = sld [smem:[#allocation2 + $0x1]] }
  0x44   : > { %v432_v2 = vld [vmem:[%s178_s19 + $0x40] sm:$0xff]  ;;  %v433_v3 = vld [vmem:[%s178_s19 + $0x48] sm:$0xff]  ;;  %v207_v5 = vld [vmem:[%s178_s19 + $0x18] sm:$0xff]  ;;  %s465_s25 = smul.u32 192, %s741_s16  ;;  %s290_s26 = scalar_lea.sflag [#allocation4], %s741_s16 }
  0x45   : > { %v208_v6 = vld [vmem:[%s178_s19 + $0x20] sm:$0xff]  ;;  %v209_v7 = vld [vmem:[%s178_s19 + $0x28] sm:$0xff]  ;;  %v210_v8 = vld [vmem:[%s178_s19 + $0x30] sm:$0xff] }
  0x46   : > { %v211_v9 = vld [vmem:[%s178_s19 + $0x38] sm:$0xff]  ;;  %v434_v11 = vld [vmem:[%s178_s19 + $0x50] sm:$0xff]  ;;  %v436_v13 = vld [vmem:[%s178_s19 + $0x60] sm:$0xff]  ;;  %s754_s20 = scalar_lea.vmem [#allocation7], %s465_s25 }
  0x47   : > { %v435_v12 = vld [vmem:[%s178_s19 + $0x58] sm:$0xff]  ;;  %v437_v18 = vld [vmem:[%s178_s19 + $0x68] sm:$0xff]  ;;  %v438_v19 = vld [vmem:[%s178_s19 + $0x70] sm:$0xff] }
  0x48   : > { %v439_v20 = vld [vmem:[%s178_s19 + $0x78] sm:$0xff] }
  0x49   : > { %v221_v10 = vstv %s202_s23  ;;  %v238_v41 = vstv %s749_s17 }
  0x4a   : > { %v222_v14 = vmul.f32 %v221_v10, %v204_v0  ;;  %v223_v15 = vmul.f32 %v221_v10, %v205_v1  ;;  %v224_v16 = vmul.f32 %v221_v10, %v206_v4  ;;  %v225_v17 = vmul.f32 %v221_v10, %v207_v5 }
  0x4b   : > { %v226_v21 = vmul.f32 %v221_v10, %v208_v6  ;;  %v227_v22 = vmul.f32 %v221_v10, %v209_v7  ;;  %v228_v23 = vmul.f32 %v221_v10, %v210_v8  ;;  %v229_v24 = vmul.f32 %v221_v10, %v211_v9 }
  0x4c   : > { %v230_v25 = vmul.f32 %v432_v2, %v222_v14  ;;  %v231_v26 = vmul.f32 %v433_v3, %v223_v15  ;;  %v232_v27 = vmul.f32 %v434_v11, %v224_v16  ;;  %v233_v28 = vmul.f32 %v435_v12, %v225_v17 }
  0x4d   : > { %v234_v29 = vmul.f32 %v436_v13, %v226_v21  ;;  %v235_v30 = vmul.f32 %v437_v18, %v227_v22  ;;  %v236_v31 = vmul.f32 %v438_v19, %v228_v23  ;;  %v237_v32 = vmul.f32 %v439_v20, %v229_v24 }
  0x4e   : > { %v247_v33 = vsub.f32 0.0, %v230_v25  ;;  %v248_v34 = vsub.f32 0.0, %v231_v26  ;;  %v249_v35 = vsub.f32 0.0, %v232_v27  ;;  %v250_v36 = vsub.f32 0.0, %v233_v28 }
  0x4f   : > { %v251_v37 = vsub.f32 0.0, %v234_v29  ;;  %v252_v38 = vsub.f32 0.0, %v235_v30  ;;  %v253_v39 = vsub.f32 0.0, %v236_v31  ;;  %v254_v40 = vsub.f32 0.0, %v237_v32 }
  0x50   : > { %255 = vst [vmem:[%s754_s20] sm:$0xff] %v247_v33  ;;  %256 = vst [vmem:[%s754_s20 + $0x8] sm:$0xff] %v248_v34  ;;  %v239_v42 = vmul.f32 %v432_v2, %v238_v41  ;;  %v240_v43 = vmul.f32 %v433_v3, %v238_v41  ;;  %v241_v44 = vmul.f32 %v434_v11, %v238_v41 }
  0x51   : > { %257 = vst [vmem:[%s754_s20 + $0x10] sm:$0xff] %v249_v35  ;;  %258 = vst [vmem:[%s754_s20 + $0x18] sm:$0xff] %v250_v36  ;;  %v242_v45 = vmul.f32 %v435_v12, %v238_v41  ;;  %v243_v46 = vmul.f32 %v436_v13, %v238_v41  ;;  %v244_v47 = vmul.f32 %v437_v18, %v238_v41 }
  0x52   : > { %259 = vst [vmem:[%s754_s20 + $0x20] sm:$0xff] %v251_v37  ;;  %260 = vst [vmem:[%s754_s20 + $0x28] sm:$0xff] %v252_v38  ;;  %v245_v48 = vmul.f32 %v438_v19, %v238_v41  ;;  %v246_v49 = vmul.f32 %v439_v20, %v238_v41  ;;  %v263_v50 = vsub.f32 %v230_v25, %v239_v42 }
  0x53   : > { %261 = vst [vmem:[%s754_s20 + $0x30] sm:$0xff] %v253_v39  ;;  %262 = vst [vmem:[%s754_s20 + $0x38] sm:$0xff] %v254_v40  ;;  %v264_v51 = vsub.f32 %v231_v26, %v240_v43  ;;  %v265_v52 = vsub.f32 %v232_v27, %v241_v44  ;;  %v266_v53 = vsub.f32 %v233_v28, %v242_v45 }
  0x54   : > { %448 = vst [vmem:[%s754_s20 + $0x80] sm:$0xff] %v239_v42  ;;  %449 = vst [vmem:[%s754_s20 + $0x88] sm:$0xff] %v240_v43  ;;  %v267_v54 = vsub.f32 %v234_v29, %v243_v46  ;;  %v268_v55 = vsub.f32 %v235_v30, %v244_v47  ;;  %v269_v56 = vsub.f32 %v236_v31, %v245_v48 }
  0x55   : > { %450 = vst [vmem:[%s754_s20 + $0x90] sm:$0xff] %v241_v44  ;;  %451 = vst [vmem:[%s754_s20 + $0x98] sm:$0xff] %v242_v45  ;;  %v270_v57 = vsub.f32 %v237_v32, %v246_v49 }
  0x56   : > { %452 = vst [vmem:[%s754_s20 + $0xa0] sm:$0xff] %v243_v46  ;;  %453 = vst [vmem:[%s754_s20 + $0xa8] sm:$0xff] %v244_v47 }
  0x57   : > { %454 = vst [vmem:[%s754_s20 + $0xb0] sm:$0xff] %v245_v48  ;;  %455 = vst [vmem:[%s754_s20 + $0xb8] sm:$0xff] %v246_v49 }
  0x58   : > { %440 = vst [vmem:[%s754_s20 + $0x40] sm:$0xff] %v263_v50  ;;  %441 = vst [vmem:[%s754_s20 + $0x48] sm:$0xff] %v264_v51 }
  0x59   : > { %442 = vst [vmem:[%s754_s20 + $0x50] sm:$0xff] %v265_v52  ;;  %443 = vst [vmem:[%s754_s20 + $0x58] sm:$0xff] %v266_v53 }
  0x5a   : > { %444 = vst [vmem:[%s754_s20 + $0x60] sm:$0xff] %v267_v54  ;;  %445 = vst [vmem:[%s754_s20 + $0x68] sm:$0xff] %v268_v55 }
  0x5b   : > { %446 = vst [vmem:[%s754_s20 + $0x70] sm:$0xff] %v269_v56  ;;  %447 = vst [vmem:[%s754_s20 + $0x78] sm:$0xff] %v270_v57 }
  0x5c   : > { %s464_s27 = sshll.u32 %s651_s13, 10  ;;  %s320_s28 = sshll.u32 %s754_s20, 4  ;;  %s321_s28 = int_to_ptr.vmem [resolvable:$true] %s320_s28 }
  0x5d   : > { %s303_s3 = scalar_lea.hbm %s821_s2, %s464_s27  ;;  %s608_s4 = smov 1024  }
  0x5e   : > { %479 = sst [smem:[#allocation11]] (%p682_p11), %s608_s4  ;;  %s609_s5 = smov 2048  }
  0x5f   : > { %480 = sst [smem:[#allocation11 + $0x1]] (%p682_p11), %s609_s5  ;;  %s610_s7 = smov 4  }
  0x60   : > { %481 = sst [smem:[#allocation11 + $0x2]] (%p682_p11), %s610_s7  ;;  %s611_s8 = smov 256  }
  0x61   : > { %482 = sst [smem:[#allocation11 + $0x3]] (%p682_p11), %s611_s8  ;;  %s612_s13 = smov 16  }
  0x62   : > { %483 = sst [smem:[#allocation11 + $0x4]] (%p682_p11), %s611_s8  ;;  %s613_s14 = smov [#allocation10]  }
  0x63   : > { %484 = sst [smem:[#allocation11 + $0x5]] (%p682_p11), %s612_s13  ;;  %s614_s16 = smov 0  }
  0x64   : > { %485 = dma.general (%p682_p11), %s321_s28, 3072, %s303_s3, %s290_s26, %s613_s14, [#allocation11], %s614_s16, 0  }
  0x65 PF: > { %s348_s6 = sand.u32 1, %s587_s9   ;;  %p492_p4 = pnand %p421_p1, %p686_p12 }
  0x66   : > { %s349_s24 = scalar_lea.sflag [#allocation4], %s348_s6 }
  0x67   : > { %582 = dma.done.wait (!%p492_p4), %s349_s24, 3072  }
  0x68   : > { %584 = vsyncadd (!%p492_p4), %s349_s24, 4294964224  ;;  %p16_p5 = scmp.ge.s32.totalorder %s655_s15, 4   ;;  %s827_s9 = smov %s591_s10 }
  0x69   : > { %s828_s10 = smov %s595_s11  ;;  %s829_s11 = smov %s667_s18 }
  0x6a   : > { %s830_s12 = smov %s655_s15  ;;  %18 = sbr.rel (!%p16_p5) target bundleno = 6 (0x6), region = 91 }
  0x71   :  { %354 = vsyncpa [#allocation3], 1 }
  0x72   :  { %356 = vsyncpa [#allocation3 + $0x1], 1 }
  0x73   :  { %357 = vsyncpa [#allocation4], 1 }
  0x74   :  { %359 = vsyncpa [#allocation4 + $0x1], 1 }
  0x75   :  { %360 = vsyncpa [#allocation5], 1 }
  0x76   :  { %362 = vsyncpa [#allocation5 + $0x1], 1 }

</bundles_post_ra>
